<compile_context>
chip_gen: v7x
topology: tpu7x:2x2x1
jax: 0.10.0
libtpu: 0.0.40
codegen_flags: <defaults>
</compile_context>

<pallas_src>
import functools

import jax
import jax.numpy as jnp
from jax.experimental import pallas as pl
from jax.experimental.pallas import tpu as pltpu

_LANES = 128
_SUBLANES = 8
_MAX_ROWS_PER_TILE = 4096          # 4096 x 128 x 4B = 2 MiB per input block
_VMEM_LIMIT_BYTES = 32 * 1024 * 1024   # safe on v5e/v6e (128 MiB) and v7x (64 MiB)
_FLAT_VMEM_BUDGET = 8 * 1024 * 1024    # pipeline footprint budget, fallback path


# -----------------------------------------------------------------------------
# Fast path: lane-dense (B, R, 128) layout, one sample per batch-grid step.
# -----------------------------------------------------------------------------
def _dice_rows_kernel(x_ref, t_ref, out_ref, inter_acc, union_acc, *,
                      smooth, valid_rows, mask_tail):
    """x_ref/t_ref: (tr, 128) feature tile of one sample.
    out_ref: (1, 128) per-sample loss broadcast across lanes (lane-dense store).
    inter_acc/union_acc: (1, 128) f32 accumulators; the cross-lane reduction is
    deferred to the finalize step so the hot loop is VPU + DMA only."""
    j = pl.program_id(1)

    @pl.when(j == 0)
    def _():
        inter_acc[...] = jnp.zeros_like(inter_acc)
        union_acc[...] = jnp.zeros_like(union_acc)

    x = x_ref[...].astype(jnp.float32)
    t = t_ref[...].astype(jnp.float32)
    tr = x.shape[0]

    if mask_tail:
        # Rows past the real per-sample row count contain clipped-DMA garbage.
        row = j * tr + jax.lax.broadcasted_iota(jnp.int32, (tr, _LANES), 0)
        valid = row < valid_rows
        x = jnp.where(valid, x, 0.0)
        t = jnp.where(valid, t, 0.0)

    prod = x * t
    sq = x * x + t * t

    # Fold the sublane/row axis per tile; keep 128 lane partials resident.
    inter_acc[...] += jnp.sum(prod, axis=0, keepdims=True)
    union_acc[...] += jnp.sum(sq, axis=0, keepdims=True)

    @pl.when(j == pl.num_programs(1) - 1)
    def _():
        inter = jnp.sum(inter_acc[...])
        union = jnp.sum(union_acc[...])
        loss = 1.0 - (2.0 * inter + smooth) / (union + smooth)
        out_ref[...] = jnp.broadcast_to(loss, out_ref.shape).astype(out_ref.dtype)


def _dice_per_sample_lane_dense(xf, tf, *, smooth):
    b, n = xf.shape
    r = n // _LANES                       # rows of 128 lanes per sample
    x3 = xf.reshape(b, r, _LANES)         # free reshape (contiguous)
    t3 = tf.reshape(b, r, _LANES)

    tr = min(_MAX_ROWS_PER_TILE, (r // _SUBLANES) * _SUBLANES)  # multiple of 8, <= r
    nj = pl.cdiv(r, tr)
    mask_tail = (r % tr) != 0

    kernel = functools.partial(_dice_rows_kernel, smooth=smooth,
                               valid_rows=r, mask_tail=mask_tail)

    bytes_accessed = (xf.size * xf.dtype.itemsize
                      + tf.size * tf.dtype.itemsize
                      + b * _LANES * 4)

    out = pl.pallas_call(
        kernel,
        out_shape=jax.ShapeDtypeStruct((b, 1, _LANES), jnp.float32),
        grid_spec=pltpu.PrefetchScalarGridSpec(
            num_scalar_prefetch=0,
            grid=(b, nj),
            in_specs=[
                pl.BlockSpec((None, tr, _LANES), lambda i, j: (i, j, 0)),
                pl.BlockSpec((None, tr, _LANES), lambda i, j: (i, j, 0)),
            ],
            out_specs=pl.BlockSpec((None, 1, _LANES), lambda i, j: (i, 0, 0)),
            scratch_shapes=[
                pltpu.VMEM((1, _LANES), jnp.float32),
                pltpu.VMEM((1, _LANES), jnp.float32),
            ],
        ),
        compiler_params=pltpu.CompilerParams(
            dimension_semantics=("parallel", "arbitrary"),
            vmem_limit_bytes=_VMEM_LIMIT_BYTES,
        ),
        cost_estimate=pl.CostEstimate(
            flops=6 * b * n, transcendentals=0, bytes_accessed=bytes_accessed),
    )(x3, t3)
    return out[:, 0, 0]


# -----------------------------------------------------------------------------
# General fallback: (B, N) layout for N not a multiple of 128 (or tiny N).
# Bounded VMEM footprint + in-kernel tail masking; never pads, never takes a
# full-N block for huge N.
# -----------------------------------------------------------------------------
def _dice_flat_kernel(x_ref, t_ref, out_ref, inter_acc, union_acc, *,
                      smooth, n_valid, mask_tail):
    k = pl.program_id(0)

    @pl.when(k == 0)
    def _():
        inter_acc[...] = jnp.zeros_like(inter_acc)
        union_acc[...] = jnp.zeros_like(union_acc)

    x = x_ref[...].astype(jnp.float32)    # (B, tn)
    t = t_ref[...].astype(jnp.float32)

    if mask_tail:
        tn = x.shape[1]
        col = k * tn + jax.lax.broadcasted_iota(jnp.int32, x.shape, 1)
        valid = col < n_valid
        x = jnp.where(valid, x, 0.0)
        t = jnp.where(valid, t, 0.0)

    inter_acc[...] += jnp.sum(x * t, axis=1, keepdims=True)
    union_acc[...] += jnp.sum(x * x + t * t, axis=1, keepdims=True)

    @pl.when(k == pl.num_programs(0) - 1)
    def _():
        loss = 1.0 - (2.0 * inter_acc[...] + smooth) / (union_acc[...] + smooth)
        out_ref[...] = jnp.broadcast_to(loss, out_ref.shape).astype(out_ref.dtype)


def _dice_per_sample_flat(xf, tf, *, smooth):
    b, n = xf.shape
    # Footprint per feature tile: 2 inputs x 2 pipeline buffers x b x tn x 4 B.
    budget_elems = max(1, _FLAT_VMEM_BUDGET // (16 * b))
    if n <= budget_elems or n <= _LANES:
        tn = n                                            # full-width single block
    else:
        tn = max(_LANES, (budget_elems // _LANES) * _LANES)
        tn = min(tn, (n // _LANES) * _LANES)              # 128-multiple, <= n
    nk = pl.cdiv(n, tn)
    mask_tail = (n % tn) != 0

    kernel = functools.partial(_dice_flat_kernel, smooth=smooth,
                               n_valid=n, mask_tail=mask_tail)

    out = pl.pallas_call(
        kernel,
        out_shape=jax.ShapeDtypeStruct((b, _LANES), jnp.float32),
        grid_spec=pltpu.PrefetchScalarGridSpec(
            num_scalar_prefetch=0,
            grid=(nk,),
            in_specs=[
                pl.BlockSpec((b, tn), lambda k: (0, k)),
                pl.BlockSpec((b, tn), lambda k: (0, k)),
            ],
            out_specs=pl.BlockSpec((b, _LANES), lambda k: (0, 0)),
            scratch_shapes=[
                pltpu.VMEM((b, 1), jnp.float32),
                pltpu.VMEM((b, 1), jnp.float32),
            ],
        ),
        compiler_params=pltpu.CompilerParams(
            dimension_semantics=("arbitrary",),
            vmem_limit_bytes=_VMEM_LIMIT_BYTES,
        ),
    )(xf, tf)
    return out[:, 0]


# -----------------------------------------------------------------------------
# Public wrapper (matches DiceLoss.forward).
# -----------------------------------------------------------------------------
def dice_loss(x, target, *, smooth=1.0):
    """x, target: (B, ...) arrays (e.g. NCHW). Returns scalar f32 loss."""
    assert x.shape == target.shape
    b = x.shape[0]
    n = 1
    for d in x.shape[1:]:
        n *= d

    xf = x.reshape(b, n)          # contiguous reshape: free, no HBM copy
    tf = target.reshape(b, n)

    if n % _LANES == 0 and n >= _SUBLANES * _LANES:
        per_sample = _dice_per_sample_lane_dense(xf, tf, smooth=float(smooth))
    else:
        per_sample = _dice_per_sample_flat(xf, tf, smooth=float(smooth))

    # Mean over batch (trivial glue, matches loss.mean()).
    return jnp.mean(per_sample)


def _reference(x, t, smooth=1.0):
    b = x.shape[0]
    xf = x.reshape(b, -1).astype(jnp.float32)
    tf = t.reshape(b, -1).astype(jnp.float32)
    inter = jnp.sum(xf * tf, axis=1)
    union = jnp.sum(xf * xf, axis=1) + jnp.sum(tf * tf, axis=1)
    return jnp.mean(1.0 - (2.0 * inter + smooth) / (union + smooth))


if __name__ == "__main__":
    key = jax.random.PRNGKey(0)
    kx, kt = jax.random.split(key)

    # Main case: lane-dense fast path (N = 4*16*16 = 1024 = 8 rows of 128).
    B, C, H, W = 2, 4, 16, 16
    x = jax.nn.sigmoid(jax.random.normal(kx, (B, C, H, W), dtype=jnp.float32))
    target = (jax.random.uniform(kt, (B, C, H, W)) > 0.5).astype(jnp.float32)

    out = jax.block_until_ready(dice_loss(x, target))
    ref = _reference(x, target)
    assert jnp.allclose(out, ref, atol=1e-5, rtol=1e-5), (out, ref)

    # Lane-dense path with a masked tail tile (N = 1920 -> 15 rows, tile = 8).
    k2, k3 = jax.random.split(kt)
    x2 = jax.nn.sigmoid(jax.random.normal(k2, (2, 3, 16, 40), dtype=jnp.float32))
    t2 = (jax.random.uniform(k3, (2, 3, 16, 40)) > 0.5).astype(jnp.float32)
    out2 = jax.block_until_ready(dice_loss(x2, t2))
    assert jnp.allclose(out2, _reference(x2, t2), atol=1e-5, rtol=1e-5), (out2,)

    # General fallback path (N = 105, not a multiple of 128).
    x3 = jax.nn.sigmoid(jax.random.normal(k2, (2, 3, 5, 7), dtype=jnp.float32))
    t3 = (jax.random.uniform(k3, (2, 3, 5, 7)) > 0.5).astype(jnp.float32)
    out3 = jax.block_until_ready(dice_loss(x3, t3))
    assert jnp.allclose(out3, _reference(x3, t3), atol=1e-5, rtol=1e-5), (out3,)

    print("KERNEL_OK")
</pallas_src>

<mosaic_0001>
module attributes {stable_mosaic.version = 11 : i64} {
  func.func @_dice_rows_kernel(%arg0: i32, %arg1: i32, %arg2: memref<1x8x128xf32, #tpu.memory_space<vmem>>, %arg3: memref<1x8x128xf32, #tpu.memory_space<vmem>>, %arg4: memref<1x1x128xf32, #tpu.memory_space<vmem>>, %arg5: memref<1x128xf32, #tpu.memory_space<vmem>>, %arg6: memref<1x128xf32, #tpu.memory_space<vmem>>) attributes {dimension_semantics = [#tpu.dimension_semantics<parallel>, #tpu.dimension_semantics<arbitrary>], iteration_bounds = array<i64: 2, 1>, scalar_prefetch = 0 : i64, scratch_operands = 2 : i64, tpu.core_type = #tpu.core_type<tc>, window_params = [{transform_indices = @transform_0, window_bounds = array<i64: 1, 8, 128>}, {transform_indices = @transform_1, window_bounds = array<i64: 1, 8, 128>}, {transform_indices = @transform_2, window_bounds = array<i64: 1, 1, 128>}]} {
    %c0_i32 = arith.constant 0 : i32
    %0 = arith.cmpi eq, %arg1, %c0_i32 : i32
    %1 = arith.extui %0 : i1 to i32
    %c0_i32_0 = arith.constant 0 : i32
    %2 = arith.cmpi ne, %1, %c0_i32_0 : i32
    scf.if %2 {
      %cst_17 = arith.constant 0.000000e+00 : f32
      %24 = vector.broadcast %cst_17 : f32 to vector<1x128xf32>
      %c0_18 = arith.constant 0 : index
      %c0_19 = arith.constant 0 : index
      %25 = vector.load %arg5[%c0_18, %c0_19] : memref<1x128xf32, #tpu.memory_space<vmem>>, vector<1x128xf32>
      tpu.vector_store %arg5[%c0_18, %c0_19], %24 {strides = array<i32>} : memref<1x128xf32, #tpu.memory_space<vmem>>, vector<1x128xf32>,
      %cst_20 = arith.constant 0.000000e+00 : f32
      %26 = vector.broadcast %cst_20 : f32 to vector<1x128xf32>
      %c0_21 = arith.constant 0 : index
      %c0_22 = arith.constant 0 : index
      %27 = vector.load %arg6[%c0_21, %c0_22] : memref<1x128xf32, #tpu.memory_space<vmem>>, vector<1x128xf32>
      tpu.vector_store %arg6[%c0_21, %c0_22], %26 {strides = array<i32>} : memref<1x128xf32, #tpu.memory_space<vmem>>, vector<1x128xf32>,
    } else {
    }
    %c0 = arith.constant 0 : index
    %c0_1 = arith.constant 0 : index
    %c0_2 = arith.constant 0 : index
    %3 = vector.load %arg2[%c0, %c0_1, %c0_2] : memref<1x8x128xf32, #tpu.memory_space<vmem>>, vector<1x8x128xf32>
    %4 = vector.shape_cast %3 : vector<1x8x128xf32> to vector<8x128xf32>
    %c0_3 = arith.constant 0 : index
    %c0_4 = arith.constant 0 : index
    %c0_5 = arith.constant 0 : index
    %5 = vector.load %arg3[%c0_3, %c0_4, %c0_5] : memref<1x8x128xf32, #tpu.memory_space<vmem>>, vector<1x8x128xf32>
    %6 = vector.shape_cast %5 : vector<1x8x128xf32> to vector<8x128xf32>
    %7 = arith.mulf %4, %6 : vector<8x128xf32>
    %8 = arith.mulf %4, %4 : vector<8x128xf32>
    %9 = arith.mulf %6, %6 : vector<8x128xf32>
    %10 = arith.addf %8, %9 : vector<8x128xf32>
    %c0_6 = arith.constant 0 : index
    %c0_7 = arith.constant 0 : index
    %11 = vector.load %arg5[%c0_6, %c0_7] : memref<1x128xf32, #tpu.memory_space<vmem>>, vector<1x128xf32>
    %cst = arith.constant dense<0.000000e+00> : vector<128xf32>
    %12 = vector.multi_reduction <add>, %7, %cst [0] : vector<8x128xf32> to vector<128xf32>
    %13 = vector.shape_cast %12 : vector<128xf32> to vector<1x128xf32>
    %14 = arith.addf %11, %13 : vector<1x128xf32>
    %c0_8 = arith.constant 0 : index
    %c0_9 = arith.constant 0 : index
    %15 = vector.load %arg5[%c0_8, %c0_9] : memref<1x128xf32, #tpu.memory_space<vmem>>, vector<1x128xf32>
    tpu.vector_store %arg5[%c0_8, %c0_9], %14 {strides = array<i32>} : memref<1x128xf32, #tpu.memory_space<vmem>>, vector<1x128xf32>,
    %c0_10 = arith.constant 0 : index
    %c0_11 = arith.constant 0 : index
    %16 = vector.load %arg6[%c0_10, %c0_11] : memref<1x128xf32, #tpu.memory_space<vmem>>, vector<1x128xf32>
    %cst_12 = arith.constant dense<0.000000e+00> : vector<128xf32>
    %17 = vector.multi_reduction <add>, %10, %cst_12 [0] : vector<8x128xf32> to vector<128xf32>
    %18 = vector.shape_cast %17 : vector<128xf32> to vector<1x128xf32>
    %19 = arith.addf %16, %18 : vector<1x128xf32>
    %c0_13 = arith.constant 0 : index
    %c0_14 = arith.constant 0 : index
    %20 = vector.load %arg6[%c0_13, %c0_14] : memref<1x128xf32, #tpu.memory_space<vmem>>, vector<1x128xf32>
    tpu.vector_store %arg6[%c0_13, %c0_14], %19 {strides = array<i32>} : memref<1x128xf32, #tpu.memory_space<vmem>>, vector<1x128xf32>,
    %c0_i32_15 = arith.constant 0 : i32
    %21 = arith.cmpi eq, %arg1, %c0_i32_15 : i32
    %22 = arith.extui %21 : i1 to i32
    %c0_i32_16 = arith.constant 0 : i32
    %23 = arith.cmpi ne, %22, %c0_i32_16 : i32
    scf.if %23 {
      %c0_17 = arith.constant 0 : index
      %c0_18 = arith.constant 0 : index
      %24 = vector.load %arg5[%c0_17, %c0_18] : memref<1x128xf32, #tpu.memory_space<vmem>>, vector<1x128xf32>
      %25 = vector.shape_cast %24 : vector<1x128xf32> to vector<1x1x128xf32>
      %cst_19 = arith.constant dense<0.000000e+00> : vector<1xf32>
      %26 = vector.multi_reduction <add>, %25, %cst_19 [1, 2] : vector<1x1x128xf32> to vector<1xf32>
      %27 = vector.shape_cast %26 : vector<1xf32> to vector<1x1x1xf32>
      %28 = vector.extract %27[0, 0, 0] : f32 from vector<1x1x1xf32>
      %c0_20 = arith.constant 0 : index
      %c0_21 = arith.constant 0 : index
      %29 = vector.load %arg6[%c0_20, %c0_21] : memref<1x128xf32, #tpu.memory_space<vmem>>, vector<1x128xf32>
      %30 = vector.shape_cast %29 : vector<1x128xf32> to vector<1x1x128xf32>
      %cst_22 = arith.constant dense<0.000000e+00> : vector<1xf32>
      %31 = vector.multi_reduction <add>, %30, %cst_22 [1, 2] : vector<1x1x128xf32> to vector<1xf32>
      %32 = vector.shape_cast %31 : vector<1xf32> to vector<1x1x1xf32>
      %33 = vector.extract %32[0, 0, 0] : f32 from vector<1x1x1xf32>
      %cst_23 = arith.constant 2.000000e+00 : f32
      %34 = arith.mulf %cst_23, %28 : f32
      %cst_24 = arith.constant 1.000000e+00 : f32
      %35 = arith.addf %34, %cst_24 : f32
      %cst_25 = arith.constant 1.000000e+00 : f32
      %36 = arith.addf %33, %cst_25 : f32
      %37 = arith.divf %35, %36 : f32
      %cst_26 = arith.constant 1.000000e+00 : f32
      %38 = arith.subf %cst_26, %37 : f32
      %39 = vector.broadcast %38 : f32 to vector<1x128xf32>
      %c0_27 = arith.constant 0 : index
      %c0_28 = arith.constant 0 : index
      %c0_29 = arith.constant 0 : index
      %40 = vector.load %arg4[%c0_27, %c0_28, %c0_29] : memref<1x1x128xf32, #tpu.memory_space<vmem>>, vector<1x1x128xf32>
      %41 = vector.shape_cast %40 : vector<1x1x128xf32> to vector<1x128xf32>
      %42 = vector.shape_cast %39 : vector<1x128xf32> to vector<1x1x128xf32>
      tpu.vector_store %arg4[%c0_27, %c0_28, %c0_29], %42 {strides = array<i32>} : memref<1x1x128xf32, #tpu.memory_space<vmem>>, vector<1x1x128xf32>,
    } else {
    }
    return
  }
  func.func @transform_0(%arg0: i32, %arg1: i32) -> (i32, i32, i32) {
    %c0_i32 = arith.constant 0 : i32
    %c0_i32_0 = arith.constant 0 : i32
    return %arg0, %arg1, %c0_i32 : i32, i32, i32
  }
  func.func @transform_1(%arg0: i32, %arg1: i32) -> (i32, i32, i32) {
    %c0_i32 = arith.constant 0 : i32
    %c0_i32_0 = arith.constant 0 : i32
    return %arg0, %arg1, %c0_i32 : i32, i32, i32
  }
  func.func @transform_2(%arg0: i32, %arg1: i32) -> (i32, i32, i32) {
    %c0_i32 = arith.constant 0 : i32
    %c0_i32_0 = arith.constant 0 : i32
    %c0_i32_1 = arith.constant 0 : i32
    return %arg0, %c0_i32, %c0_i32_0 : i32, i32, i32
  }
}

</mosaic_0001>

<bundles_post_ra>
// kernel: tpu_custom_call.1
= control target key start
LH: loop header
LB: loop body
LE: loop exit
PB: predicated region body
PF: predicated region fallthrough
CT: control target
= control target key end

     0   :  { %7 = vsyncpa [#allocation5], 0  ;;  %s869_s0 = inlined_call_operand.hbm [shape: f32[2,8,128], index: 0, kind: input, shape index: {}]   ;;  %s870_s1 = inlined_call_operand.hbm [shape: f32[2,8,128], index: 1, kind: input, shape index: {}]   ;;  %s871_s2 = inlined_call_operand.hbm [shape: f32[2,1,128], index: 2, kind: output, shape index: {}]  }
   0x1   :  { %9 = vsyncpa [#allocation5 + $0x1], 0 }
   0x2   :  { %10 = vsyncpa [#allocation8], 0 }
   0x3   :  { %12 = vsyncpa [#allocation8 + $0x1], 0 }
   0x4   :  { %13 = vsyncpa [#allocation6], 0 }
   0x5   :  { %15 = vsyncpa [#allocation6 + $0x1], 0  ;;  %s648_s9 = smov 0   ;;  %s650_s10 = smov 0  }
   0x6   :  { %s652_s11 = smov 0   ;;  %s654_s12 = smov 0  }
   0x7   :  { %s656_s13 = smov 0   ;;  %s658_s14 = smov 0  }
   0x8 LB: > { %s391_s15 = sadd.s32 4294967295, %s627_s14   ;;  %s392_s16 = sadd.s32 4294967294, %s627_s14   ;;  %s627_s14 = sphi %s658_s14, %s21_s14   ;;  %s623_s13 = sphi %s656_s13, %s891_s13   ;;  %s619_s12 = sphi %s654_s12, %s890_s12   ;;  %s615_s11 = sphi %s652_s11, %s889_s11   ;;  %s611_s10 = sphi %s650_s10, %s888_s10   ;;  %s607_s9 = sphi %s648_s9, %s887_s9  }
   0x9   : > { %s33_s17 = sadd.s32 1, %s623_s13  ;;  %s42_s18 = sadd.s32 1, %s615_s11 }
   0xa   : > { %p35_p0 = scmp.ge.s32.totalorder %s33_s17, 2  ;;  %p49_p1 = scmp.ne.s32.totalorder %s615_s11, %s611_s10 }
   0xb   : > { %p50_p2 = scmp.eq.s32.totalorder %s627_s14, 0  ;;  %p55_p3 = scmp.ne.s32.totalorder %s611_s10, %s607_s9 }
   0xc   : > { %s893_s17 = smov (%p35_p0, %s33_s17), 0  ;;  %p56_p5 = scmp.eq.s32.totalorder %s391_s15, 0 }
   0xd   : > { %p689_p4 = por %p50_p2, %p49_p1  ;;  %s37_s20 = ssub.s32 %s623_s13, %s893_s17 }
   0xe   : > { %p107_p6 = scmp.eq.s32.totalorder %s391_s15, 1  ;;  %p40_p7 = scmp.eq.s32.totalorder %s37_s20, 0 }
   0xf   : > { %p695_p8 = por %p56_p5, %p55_p3  ;;  %p113_p10 = scmp.eq.s32.totalorder %s392_s16, 1 }
  0x10   : > { %p699_p9 = por %p107_p6, %p49_p1  ;;  %p428_p13 = scmp.lt.s32.totalorder %s627_s14, 2 }
  0x11   : > { %s875_s21 = scalar_select %p695_p8, 1, 0 }
  0x12   : > { %s876_s22 = scalar_select %p699_p9, 1, 0 }
  0x13   : > { %s704_s23 = scalar_select %p40_p7, %s615_s11, %s42_s18  }
  0x14   : > { %p706_p11 = por %p113_p10, %p55_p3  ;;  %s713_s25 = sand.u32 1, %s615_s11  }
  0x15   : > { %s395_s26 = sshll.u32 %s713_s25, 3  ;;  %s396_s27 = sshll.u32 %s623_s13, 7 }
  0x16   : > { %s877_s24 = scalar_select %p706_p11, 1, 0 }
  0x17   : > { %s722_s30 = scalar_lea.hbm %s869_s0, %s396_s27  ;;  %s137_s3 = scalar_lea.vmem [#allocation4], %s395_s26 }
  0x18   : > { %s145_s4 = sshll.u32 %s137_s3, 4  ;;  %p730_p0 = pnand %p428_p13, %p689_p4  ;;  %s726_s4 = int_to_ptr.vmem [resolvable:$true] %s145_s4 }
  0x19   : > { %s134_s6 = scalar_lea.sflag [#allocation5], %s713_s25  ;;  %s481_s7 = scalar_lea.hbm %s722_s30, 128 }
  0x1a   : > { %p482_p3 = scmp.ne.s32.totalorder %s722_s30, %s481_s7  ;;  %p483_p5 = pneg %p730_p0 }
  0x1b   : > { %s486_s16 = scalar_lea.hbm %s869_s0, 256  ;;  %p487_p4 = scmp.lt.u32.totalorder %s722_s30, %s869_s0 }
  0x1c   : > { %p484_p6 = pnand %p483_p5, %p482_p3  ;;  %p488_p10 = scmp.lt.u32.totalorder %s486_s16, %s481_s7 }
  0x1d   : > { %p490_p12 = scmp.lt.u32.totalorder %s481_s7, %s722_s30 }
  0x1e   : > { %p485_p7 = pneg %p484_p6  ;;  %p489_p13 = por %p488_p10, %p487_p4 }
  0x20   : > { %p491_p1 = por %p490_p12, %p489_p13 }
  0x22   : > { %p492_p2 = pnand %p491_p1, %p485_p7 }
  0x24   : > { %495 = shalt.err (!%p492_p2)
}
  0x25   : > { %s496_s20 = scalar_lea.vmem %s726_s4, 128  ;;  %s629_s28 = smov [#allocation4]  }
  0x26   : > { %p497_p3 = scmp.ne.s32.totalorder %s726_s4, %s496_s20  ;;  %s501_s29 = sshll.u32 %s629_s28, 4  ;;  %s502_s29 = int_to_ptr.vmem [resolvable:$false] %s501_s29 }
  0x27   : > { %s503_s3 = scalar_lea.vmem %s502_s29, 256  ;;  %p504_p9 = scmp.lt.s32.totalorder %s726_s4, %s502_s29 }
  0x28   : > { %p499_p6 = pnand %p497_p3, %p483_p5  ;;  %p505_p4 = scmp.lt.s32.totalorder %s503_s3, %s496_s20 }
  0x2a   : > { %p500_p11 = pneg %p499_p6  ;;  %p506_p10 = por %p505_p4, %p504_p9 }
  0x2c   : > { %p507_p12 = pnand %p506_p10, %p500_p11 }
  0x2e   : > { %510 = shalt.err (!%p507_p12)
}
  0x2f   : > { %420 = dma.hbm_to_vmem [thread:$0]  (!%p730_p0), %s722_s30, 128, %s726_s4, %s134_s6  }
  0x30   : > { %p879_p1 = scmp.lt.s32.totalorder %s627_s14, 3  ;;  %p880_p2 = scmp.ge.s32.totalorder %s627_s14, 1 }
  0x31   : > { %s775_s16 = scalar_lea.hbm %s870_s1, %s396_s27  ;;  %s156_s18 = scalar_lea.vmem [#allocation7], %s395_s26 }
  0x32   : > { %p766_p7 = pnand %p880_p2, %p879_p1  ;;  %s164_s19 = sshll.u32 %s156_s18, 4  ;;  %s165_s19 = int_to_ptr.vmem [resolvable:$true] %s164_s19 }
  0x33   : > { %s153_s30 = scalar_lea.sflag [#allocation8], %s713_s25  ;;  %s511_s4 = scalar_lea.hbm %s775_s16, 128 }
  0x34   : > { %s881_s7 = scalar_select %p766_p7, 1, 0 }
  0x35   : > { %p512_p9 = scmp.ne.s32.totalorder %s775_s16, %s511_s4  ;;  %s516_s27 = scalar_lea.hbm %s870_s1, 256 }
  0x36   : > { %p517_p3 = scmp.lt.u32.totalorder %s775_s16, %s870_s1  ;;  %p518_p6 = scmp.lt.u32.totalorder %s516_s27, %s511_s4 }
  0x37   : > { %p514_p11 = pnand %p512_p9, %p483_p5  ;;  %p520_p10 = scmp.lt.u32.totalorder %s511_s4, %s775_s16 }
  0x38   : > { %p519_p4 = por %p518_p6, %p517_p3 }
  0x39   : > { %p515_p13 = pneg %p514_p11 }
  0x3a   : > { %p521_p12 = por %p520_p10, %p519_p4 }
  0x3c   : > { %p522_p1 = pnand %p521_p12, %p515_p13 }
  0x3e   : > { %525 = shalt.err (!%p522_p1)
}
  0x3f   : > { %s526_s25 = scalar_lea.vmem %s165_s19, 128  ;;  %s630_s26 = smov [#allocation7]  }
  0x40   : > { %p527_p2 = scmp.ne.s32.totalorder %s165_s19, %s526_s25  ;;  %s531_s3 = sshll.u32 %s630_s26, 4  ;;  %s532_s3 = int_to_ptr.vmem [resolvable:$false] %s531_s3 }
  0x41   : > { %s533_s8 = scalar_lea.vmem %s532_s3, 256  ;;  %p534_p8 = scmp.lt.s32.totalorder %s165_s19, %s532_s3 }
  0x42   : > { %p529_p9 = pnand %p527_p2, %p483_p5  ;;  %p535_p7 = scmp.lt.s32.totalorder %s533_s8, %s526_s25 }
  0x44   : > { %p530_p11 = pneg %p529_p9  ;;  %p536_p3 = por %p535_p7, %p534_p8 }
  0x46   : > { %p537_p6 = pnand %p536_p3, %p530_p11 }
  0x48   : > { %540 = shalt.err (!%p537_p6)
}
  0x49   : > { %423 = dma.hbm_to_vmem [thread:$0]  (!%p730_p0), %s775_s16, 128, %s165_s19, %s153_s30  }
  0x4a   : > { %p882_p13 = scmp.ne.s32.totalorder %s881_s7, 0 }
  0x4b   : > { %s802_s15 = sand.u32 (!%p882_p13), 1, %s611_s10   ;;  %p883_p5 = scmp.ne.s32.totalorder (!%p882_p13), %s875_s21, 0 }
  0x4c   : > { %173 = sbr.rel (%p882_p13) target bundleno = 403 (0x193), region = 28  ;;  %s400_s18 = sshll.u32 (!%p882_p13), %s802_s15, 3 }
  0x4d   : > { %s176_s4 = scalar_lea.sflag (!%p882_p13), [#allocation5], %s802_s15  ;;  %s179_s6 = scalar_lea.vmem (!%p882_p13), [#allocation4], %s400_s18 }
  0x53   : > { %594 = dma.done.wait (%p883_p5), %s176_s4, 128  }
  0x54   : > { %596 = vsyncadd (%p883_p5), %s176_s4, 4294967168  ;;  %s185_s5 = scalar_lea.sflag [#allocation8], %s802_s15  ;;  %s188_s16 = scalar_lea.vmem [#allocation7], %s400_s18 }
  0x55   : > { %598 = dma.done.wait (%p883_p5), %s185_s5, 128  }
  0x56   : > { %600 = vsyncadd (%p883_p5), %s185_s5, 4294967168  ;;  %v631_v0 = vmov 0.0   ;;  %v219_v1 = vld [vmem:[%s179_s6] sm:$0xff]  ;;  %v220_v2 = vld [vmem:[%s188_s16] sm:$0xff]  ;;  %vm247_vm0 = vcmask 1040384   ;;  %s402_s28 = sshll.u32 %s619_s12, 4 }
  0x57   : > { %217 = vst [vmem:[#allocation2] sm:$0x1] %v631_v0  ;;  %218 = vst [vmem:[#allocation3] sm:$0x1] %v631_v0  ;;  %v221_v3 = vmul.f32 %v220_v2, %v219_v1  ;;  %v222_v4 = vmul.f32 %v219_v1, %v219_v1  ;;  %v223_v5 = vmul.f32 %v220_v2, %v220_v2  ;;  %s212_s25 = scalar_lea.vmem [#allocation9], %s802_s15  ;;  %s820_s4 = scalar_lea.hbm %s871_s2, %s402_s28 }
  0x58   : > { %s292_s26 = sshll.u32 %s212_s25, 4  ;;  %s280_s6 = scalar_lea.sflag [#allocation6], %s802_s15  ;;  %s822_s26 = int_to_ptr.vmem [resolvable:$true] %s292_s26 }
  0x59   : > { %v226_v6 = vrot.slane %v221_v3, 4  ;;  %v224_v7 = vadd.f32 %v223_v5, %v222_v4  ;;  %s541_s5 = scalar_lea.vmem %s822_s26, 16  ;;  %p884_p0 = scmp.ne.s32.totalorder %s876_s22, 0 }
  0x5a   : > { %p542_p8 = scmp.ne.s32.totalorder %s822_s26, %s541_s5  ;;  %s632_s12 = smov [#allocation9]  }
  0x5b   : > { %v227_v8 = vadd.f32 %v226_v6, %v221_v3  ;;  %v235_v9 = vrot.slane %v224_v7, 4  ;;  %s545_s16 = sshll.u32 %s632_s12, 4  ;;  %s546_s16 = int_to_ptr.vmem [resolvable:$false] %s545_s16 }
  0x5c   : > { %p543_p7 = pnand %p542_p8, %p884_p0  ;;  %p548_p10 = scmp.lt.s32.totalorder %s822_s26, %s546_s16 }
  0x5d   : > { %v228_v10 = vrot.slane %v227_v8, 2  ;;  %v236_v11 = vadd.f32 %v235_v9, %v224_v7 }
  0x5e   : > { %v225_v16 = vld [vmem:[#allocation2] sm:$0x1]  ;;  %v234_v19 = vld [vmem:[#allocation3] sm:$0x1]  ;;  %p544_p4 = pneg %p543_p7 }
  0x5f   : > { %v229_v12 = vadd.f32 %v228_v10, %v227_v8  ;;  %v237_v13 = vrot.slane %v236_v11, 2 }
  0x61   : > { %v230_v14 = vrot.slane %v229_v12, 1  ;;  %v238_v15 = vadd.f32 %v237_v13, %v236_v11 }
  0x63   : > { %v231_v17 = vadd.f32 %v230_v14, %v229_v12  ;;  %v239_v18 = vrot.slane %v238_v15, 1 }
  0x65   : > { %v232_v20 = vadd.f32 %v231_v17, %v225_v16  ;;  %v240_v21 = vadd.f32 %v239_v18, %v238_v15 }
  0x67   : > { %233 = vst [vmem:[#allocation2] sm:$0x1] %v232_v20  ;;  %v241_v22 = vadd.f32 %v240_v21, %v234_v19 }
  0x69   : > { %242 = vst [vmem:[#allocation3] sm:$0x1] %v241_v22 }
  0x6e   : > { %v246_v23 = vld [vmem:[#allocation2] sm:$0x1] }
  0x6f   : > { %v248_v24 = vsel %vm247_vm0, %v246_v23, 0.0 }
  0x70   : > { %249 = vadd.xlane.f32.xlu0 %v248_v24  ;;  %v258_v25 = vld [vmem:[#allocation3] sm:$0x1] }
  0x71   : > { %v259_v26 = vsel %vm247_vm0, %v258_v25, 0.0 }
  0x74   : > { %260 = vadd.xlane.f32.xlu0 %v259_v26 }
  0xfd   : > { %v250_v27 = vpop.xlane.xlu0 %249 }
  0xfe   : > { %v251_v28 = vrot.slane %v250_v27, 4 }
 0x100   : > { %v252_v29 = vadd.f32 %v251_v28, %v250_v27 }
 0x101   : > { %v261_v30 = vpop.xlane.xlu0 %260 }
 0x102   : > { %v253_v31 = vrot.slane %v252_v29, 2  ;;  %v262_v32 = vrot.slane %v261_v30, 4 }
 0x104   : > { %v263_v33 = vadd.f32 %v262_v32, %v261_v30  ;;  %v254_v34 = vadd.f32 %v253_v31, %v252_v29 }
 0x106   : > { %v264_v35 = vrot.slane %v263_v33, 2  ;;  %v255_v36 = vrot.slane %v254_v34, 1 }
 0x108   : > { %v265_v37 = vadd.f32 %v264_v35, %v263_v33  ;;  %v256_v38 = vadd.f32 %v255_v36, %v254_v34 }
 0x10a   : > { %405 = vpush %v256_v38  ;;  %v266_v39 = vrot.slane %v265_v37, 1 }
 0x10c   : > { %v267_v40 = vadd.f32 %v266_v39, %v265_v37 }
 0x10e   : > { %407 = vpush %v267_v40 }
 0x13b   : > { %s406_s21 = spop %405 }
 0x13c   : > { %s269_s30 = smul.f32 2.0, %s406_s21  ;;  %s547_s21 = scalar_lea.vmem %s546_s16, 32 }
 0x13d   : > { %p549_p12 = scmp.lt.s32.totalorder %s547_s21, %s541_s5 }
 0x13e   : > { %s270_s20 = sadd.f32 1.0, %s269_s30 }
 0x13f   : > { %s408_s7 = spop %407  ;;  %p550_p1 = por %p549_p12, %p548_p10 }
 0x140   : > { %s271_s19 = sadd.f32 1.0, %s408_s7 }
 0x141   : > { %p551_p2 = pnand %p550_p1, %p544_p4 }
 0x142   : > { %v272_v41 = vstv %s271_s19 }
 0x143   : > { %479 = vrcp.f32 %v272_v41 }
 0x14d   : > { %v480_v42 = vpop.eup %479 }
 0x14e   : > { %409 = vpush %v480_v42 }
 0x17f   : > { %s410_s27 = spop %409 }
 0x180   : > { %s275_s29 = smul.f32 %s410_s27, %s270_s20 }
 0x182   : > { %s276_s3 = ssub.f32 1.0, %s275_s29 }
 0x184   : > { %v277_v43 = vstv %s276_s3 }
 0x185   : > { %278 = vst [vmem:[%s212_s25] sm:$0x1] %v277_v43 }
 0x186   : > { %554 = shalt.err (!%p551_p2)
}
 0x187   : > { %s555_s15 = scalar_lea.hbm %s820_s4, 16  ;;  %s559_s30 = scalar_lea.hbm %s871_s2, 32 }
 0x188   : > { %p556_p9 = scmp.ne.s32.totalorder %s820_s4, %s555_s15  ;;  %p560_p6 = scmp.lt.u32.totalorder %s820_s4, %s871_s2 }
 0x189   : > { %p561_p13 = scmp.lt.u32.totalorder %s559_s30, %s555_s15  ;;  %p563_p8 = scmp.lt.u32.totalorder %s555_s15, %s820_s4 }
 0x18a   : > { %p557_p11 = pnand %p556_p9, %p884_p0 }
 0x18b   : > { %p562_p5 = por %p561_p13, %p560_p6 }
 0x18c   : > { %p558_p3 = pneg %p557_p11 }
 0x18d   : > { %p564_p7 = por %p563_p8, %p562_p5 }
 0x18f   : > { %p565_p4 = pnand %p564_p7, %p558_p3 }
 0x191   : > { %568 = shalt.err (!%p565_p4)
}
 0x192   : > { %415 = dma.vmem_to_hbm [thread:$0]  (%p884_p0), %s822_s26, 16, %s820_s4, %s280_s6  }
 0x193 PF: > { %s304_s28 = sand.u32 1, %s607_s9   ;;  %p885_p10 = scmp.ne.s32.totalorder %s877_s24, 0 }
 0x194   : > { %p886_p12 = scmp.ge.s32.totalorder %s627_s14, 2  ;;  %s305_s29 = scalar_lea.sflag [#allocation6], %s304_s28 }
 0x196   : > { %p425_p1 = pnand %p886_p12, %p885_p10 }
 0x198   : > { %602 = dma.done.wait (!%p425_p1), %s305_s29, 16  }
 0x199   : > { %604 = vsyncadd (!%p425_p1), %s305_s29, 4294967280  ;;  %s21_s14 = sadd.s32 1, %s627_s14   ;;  %s887_s9 = smov %s611_s10 }
 0x19a   : > { %p18_p2 = scmp.ge.s32.totalorder %s21_s14, 4   ;;  %s888_s10 = smov %s615_s11 }
 0x19b   : > { %s889_s11 = smov %s704_s23  ;;  %s890_s12 = smov %s623_s13 }
 0x19c   : > { %s891_s13 = smov %s893_s17  ;;  %20 = sbr.rel (!%p18_p2) target bundleno = 8 (0x8), region = 94 }
 0x1a3   :  { %309 = vsyncpa [#allocation5], 1 }
 0x1a4   :  { %311 = vsyncpa [#allocation5 + $0x1], 1 }
 0x1a5   :  { %312 = vsyncpa [#allocation8], 1 }
 0x1a6   :  { %314 = vsyncpa [#allocation8 + $0x1], 1 }
 0x1a7   :  { %315 = vsyncpa [#allocation6], 1 }
 0x1a8   :  { %317 = vsyncpa [#allocation6 + $0x1], 1 }

</bundles_post_ra>
